<compile_context>
chip_gen: v7x
topology: tpu7x:2x2x1
jax: 0.10.0
libtpu: 0.0.40
codegen_flags: <defaults>
</compile_context>

<pallas_src>
import functools

import jax
import jax.numpy as jnp
import numpy as np
from jax.experimental import pallas as pl
from jax.experimental.pallas import tpu as pltpu


def _round_up(x, m):
    return ((x + m - 1) // m) * m


def _pick_row_tile(T, context):
    """Row (time) tile: full T when small, else ~512 rows (>= halo, multiple of 8)."""
    halo = context - 1
    if T <= 1024:
        return T                      # full dim -> always a legal block size
    return max(512, _round_up(halo, 8))


def _pick_halo_block(tile_t, halo):
    """Smallest multiple-of-8 divisor of tile_t covering the halo; fall back to tile_t."""
    for d in range(8, tile_t, 8):
        if tile_t % d == 0 and d >= halo:
            return d
    return tile_t                     # tile_t itself is always a legal block size here


def _pick_lane_tile(L):
    if L > 512 and L % 128 == 0:
        return 512
    return L                          # full dim -> always legal


def _lookahead_kernel(x_ref, halo_ref, w_ref, o_ref, *, context, total_rows):
    """x_ref: (tile_t, tile_l) rows of x, halo_ref: (halo_blk, tile_l) rows of the
    next row tile, w_ref: (context, tile_l), o_ref: (tile_t, tile_l)."""
    tile_t, lanes = x_ref.shape
    halo_blk = halo_ref.shape[0]
    i = pl.program_id(1)                       # row-tile index (grid = (lane, row))
    row0 = i * tile_t

    cur = x_ref[...].astype(jnp.float32)
    hal = halo_ref[...].astype(jnp.float32)
    parts = [cur, hal]
    # Only possible when there is a single row tile: top up with explicit zeros
    # (those rows lie past the sequence end, which is zero-padded by definition).
    if halo_blk < context - 1:
        parts.append(jnp.zeros((context - 1 - halo_blk, lanes), jnp.float32))
    full = jnp.concatenate(parts, axis=0)      # (tile_t + halo(+pad), lanes)

    # Zero rows at/after the true sequence end.  This implements the
    # F.pad(..., (0, context-1)) semantics and also neutralizes unspecified data
    # in partial edge blocks / clamped halo blocks.
    ridx = row0 + jax.lax.broadcasted_iota(jnp.int32, full.shape, 0)
    full = jnp.where(ridx < total_rows, full, 0.0)

    w = w_ref[...].astype(jnp.float32)         # (context, lanes)
    acc = full[0:tile_t, :] * w[0, :][None, :]
    for c in range(1, context):                # context is a small static constant
        acc = acc + full[c:c + tile_t, :] * w[c, :][None, :]
    o_ref[...] = acc.astype(o_ref.dtype)       # single unmasked store per tile


def lookahead(x, weight, *, row_tile=None, lane_tile=None):
    """Pallas Lookahead forward.

    x:      (T, N, H)  -- seq-major, same layout as the PyTorch module's input.
    weight: (H, 1, C)  -- nn.Conv1d(H, H, C, groups=H, bias=None).weight layout.
    returns (T, N, H), same dtype as x.
    """
    T, N, H = x.shape
    C = weight.shape[-1]
    L = N * H

    # Lane-dense 2D view: rows = time, lanes = batch*features (reshape is free).
    x2 = x.reshape(T, L)
    # (H, 1, C) -> (C, H) -> replicate across batch so lane n*H+h carries w[c, h].
    w2 = jnp.tile(jnp.transpose(weight[:, 0, :], (1, 0)), (1, N))    # (C, L)

    tile_t = row_tile if row_tile is not None else _pick_row_tile(T, C)
    tile_l = lane_tile if lane_tile is not None else _pick_lane_tile(L)
    halo_blk = _pick_halo_block(tile_t, C - 1)
    ratio = tile_t // halo_blk
    n_row = pl.cdiv(T, tile_t)
    n_lane = pl.cdiv(L, tile_l)
    n_halo_blocks = pl.cdiv(T, halo_blk)

    if n_row > 1:
        # Multi-tile path requires the halo of one tile to fit in one halo block.
        assert tile_t % 8 == 0 and halo_blk >= C - 1, (tile_t, halo_blk, C)

    kernel = functools.partial(_lookahead_kernel, context=C, total_rows=T)

    def cur_map(j, i):
        return (i, j)

    def halo_map(j, i):
        # First halo_blk rows of the next row tile; clamp at the end (masked in-kernel).
        return (jnp.minimum((i + 1) * ratio, n_halo_blocks - 1), j)

    def w_map(j, i):
        return (0, j)        # constant along the inner (row) axis -> no re-DMA

    itemsize = np.dtype(x.dtype).itemsize
    cost = pl.CostEstimate(
        flops=2 * T * L * C,
        transcendentals=0,
        bytes_accessed=2 * T * L * itemsize + C * L * itemsize,
    )

    out2 = pl.pallas_call(
        kernel,
        out_shape=jax.ShapeDtypeStruct((T, L), x.dtype),
        grid=(n_lane, n_row),
        in_specs=[
            pl.BlockSpec((tile_t, tile_l), cur_map),
            pl.BlockSpec((halo_blk, tile_l), halo_map),
            pl.BlockSpec((C, tile_l), w_map),
        ],
        out_specs=pl.BlockSpec((tile_t, tile_l), cur_map),
        compiler_params=pltpu.CompilerParams(
            dimension_semantics=("parallel", "parallel"),
        ),
        cost_estimate=cost,
    )(x2, x2, w2)
    return out2.reshape(T, N, H)


def lookahead_ref(x, weight):
    """Pure-JAX reference matching the PyTorch module exactly."""
    T, N, H = x.shape
    C = weight.shape[-1]
    x_pad = jnp.concatenate([x, jnp.zeros((C - 1, N, H), x.dtype)], axis=0)
    out = jnp.zeros((T, N, H), jnp.float32)
    for c in range(C):
        out = out + x_pad[c:c + T].astype(jnp.float32) * weight[:, 0, c][None, None, :]
    return out.astype(x.dtype)


if __name__ == "__main__":
    key = jax.random.PRNGKey(0)

    # Test 1: canonical small shapes (seq T=8, batch N=2, n_features H=32, context=3).
    T, N, H, context = 8, 2, 32, 3
    kx, kw, key = jax.random.split(key, 3)
    x = jax.random.normal(kx, (T, N, H), dtype=jnp.float32)
    bound = 1.0 / np.sqrt(1 * context)     # nn.Conv1d default init bound
    weight = jax.random.uniform(kw, (H, 1, context), dtype=jnp.float32,
                                minval=-bound, maxval=bound)

    out = jax.block_until_ready(lookahead(x, weight))
    expected = lookahead_ref(x, weight)
    assert out.shape == (T, N, H) and out.dtype == x.dtype
    np.testing.assert_allclose(np.asarray(out), np.asarray(expected),
                               rtol=1e-5, atol=1e-5)

    # Test 2: exercise the tiled path (multiple row tiles, halo blocks, partial
    # edge tiles, lane tiling) using forced small tile sizes.
    T2, N2, H2, context2 = 300, 4, 128, 7
    kx2, kw2 = jax.random.split(key)
    xb = jax.random.normal(kx2, (T2, N2, H2), dtype=jnp.float32)
    bound2 = 1.0 / np.sqrt(1 * context2)
    wb = jax.random.uniform(kw2, (H2, 1, context2), dtype=jnp.float32,
                            minval=-bound2, maxval=bound2)

    outb = jax.block_until_ready(lookahead(xb, wb, row_tile=64, lane_tile=128))
    expectedb = lookahead_ref(xb, wb)
    np.testing.assert_allclose(np.asarray(outb), np.asarray(expectedb),
                               rtol=1e-5, atol=1e-5)

    print("KERNEL_OK")
</pallas_src>

<mosaic_0001>
module attributes {stable_mosaic.version = 11 : i64} {
  func.func @_lookahead_kernel(%arg0: i32, %arg1: i32, %arg2: memref<8x64xf32, #tpu.memory_space<vmem>>, %arg3: memref<8x64xf32, #tpu.memory_space<vmem>>, %arg4: memref<3x64xf32, #tpu.memory_space<vmem>>, %arg5: memref<8x64xf32, #tpu.memory_space<vmem>>) attributes {dimension_semantics = [#tpu.dimension_semantics<parallel>, #tpu.dimension_semantics<parallel>], iteration_bounds = array<i64: 1, 1>, scalar_prefetch = 0 : i64, scratch_operands = 0 : i64, tpu.core_type = #tpu.core_type<tc>, window_params = [{transform_indices = @transform_0, window_bounds = array<i64: 8, 64>}, {transform_indices = @transform_1, window_bounds = array<i64: 8, 64>}, {transform_indices = @transform_2, window_bounds = array<i64: 3, 64>}, {transform_indices = @transform_3, window_bounds = array<i64: 8, 64>}]} {
    %c8_i32 = arith.constant 8 : i32
    %0 = arith.muli %arg1, %c8_i32 : i32
    %c0 = arith.constant 0 : index
    %c0_0 = arith.constant 0 : index
    %1 = vector.load %arg2[%c0, %c0_0] : memref<8x64xf32, #tpu.memory_space<vmem>>, vector<8x64xf32>
    %c0_1 = arith.constant 0 : index
    %c0_2 = arith.constant 0 : index
    %2 = vector.load %arg3[%c0_1, %c0_2] : memref<8x64xf32, #tpu.memory_space<vmem>>, vector<8x64xf32>
    %3 = tpu.concatenate %1, %2 in 0 : vector<8x64xf32>, vector<8x64xf32> -> vector<16x64xf32>
    %4 = tpu.iota {dimensions = array<i32: 0>} : vector<16x64xi32>
    %5 = vector.broadcast %0 : i32 to vector<16x64xi32>
    %6 = arith.addi %5, %4 : vector<16x64xi32>
    %c8_i32_3 = arith.constant 8 : i32
    %7 = vector.broadcast %c8_i32_3 : i32 to vector<16x64xi32>
    %8 = arith.cmpi slt, %6, %7 : vector<16x64xi32>
    %cst = arith.constant 0.000000e+00 : f32
    %9 = vector.broadcast %cst : f32 to vector<16x64xf32>
    %10 = arith.select %8, %3, %9 : vector<16x64xi1>, vector<16x64xf32>
    %c0_4 = arith.constant 0 : index
    %c0_5 = arith.constant 0 : index
    %11 = vector.load %arg4[%c0_4, %c0_5] : memref<3x64xf32, #tpu.memory_space<vmem>>, vector<3x64xf32>
    %12 = vector.extract_strided_slice %10 {offsets = [0, 0], sizes = [8, 64], strides = [1, 1]} : vector<16x64xf32> to vector<8x64xf32>
    %13 = vector.extract_strided_slice %11 {offsets = [0, 0], sizes = [1, 64], strides = [1, 1]} : vector<3x64xf32> to vector<1x64xf32>
    %14 = vector.shape_cast %13 : vector<1x64xf32> to vector<64xf32>
    %15 = vector.shape_cast %14 : vector<64xf32> to vector<1x64xf32>
    %16 = vector.broadcast %15 : vector<1x64xf32> to vector<8x64xf32>
    %17 = arith.mulf %12, %16 : vector<8x64xf32>
    %18 = vector.extract_strided_slice %10 {offsets = [1, 0], sizes = [8, 64], strides = [1, 1]} : vector<16x64xf32> to vector<8x64xf32>
    %19 = vector.extract_strided_slice %11 {offsets = [1, 0], sizes = [1, 64], strides = [1, 1]} : vector<3x64xf32> to vector<1x64xf32>
    %20 = vector.shape_cast %19 : vector<1x64xf32> to vector<64xf32>
    %21 = vector.shape_cast %20 : vector<64xf32> to vector<1x64xf32>
    %22 = vector.broadcast %21 : vector<1x64xf32> to vector<8x64xf32>
    %23 = arith.mulf %18, %22 : vector<8x64xf32>
    %24 = arith.addf %17, %23 : vector<8x64xf32>
    %25 = vector.extract_strided_slice %10 {offsets = [2, 0], sizes = [8, 64], strides = [1, 1]} : vector<16x64xf32> to vector<8x64xf32>
    %26 = vector.extract_strided_slice %11 {offsets = [2, 0], sizes = [1, 64], strides = [1, 1]} : vector<3x64xf32> to vector<1x64xf32>
    %27 = vector.shape_cast %26 : vector<1x64xf32> to vector<64xf32>
    %28 = vector.shape_cast %27 : vector<64xf32> to vector<1x64xf32>
    %29 = vector.broadcast %28 : vector<1x64xf32> to vector<8x64xf32>
    %30 = arith.mulf %25, %29 : vector<8x64xf32>
    %31 = arith.addf %24, %30 : vector<8x64xf32>
    %c0_6 = arith.constant 0 : index
    %c0_7 = arith.constant 0 : index
    %32 = vector.load %arg5[%c0_6, %c0_7] : memref<8x64xf32, #tpu.memory_space<vmem>>, vector<8x64xf32>
    tpu.vector_store %arg5[%c0_6, %c0_7], %31 {strides = array<i32>} : memref<8x64xf32, #tpu.memory_space<vmem>>, vector<8x64xf32>,
    return
  }
  func.func @transform_0(%arg0: i32, %arg1: i32) -> (i32, i32) {
    %c0_i32 = arith.constant 0 : i32
    return %arg1, %arg0 : i32, i32
  }
  func.func @transform_1(%arg0: i32, %arg1: i32) -> (i32, i32) {
    %c1_i32 = arith.constant 1 : i32
    %0 = arith.addi %arg1, %c1_i32 : i32
    %c1_i32_0 = arith.constant 1 : i32
    %1 = arith.muli %0, %c1_i32_0 : i32
    %c0_i32 = arith.constant 0 : i32
    %2 = arith.minsi %1, %c0_i32 : i32
    %c0_i32_1 = arith.constant 0 : i32
    return %2, %arg0 : i32, i32
  }
  func.func @transform_2(%arg0: i32, %arg1: i32) -> (i32, i32) {
    %c0_i32 = arith.constant 0 : i32
    %c0_i32_0 = arith.constant 0 : i32
    return %c0_i32, %arg0 : i32, i32
  }
  func.func @transform_3(%arg0: i32, %arg1: i32) -> (i32, i32) {
    %c0_i32 = arith.constant 0 : i32
    return %arg1, %arg0 : i32, i32
  }
}

</mosaic_0001>

<bundles_post_ra>
// kernel: tpu_custom_call.1
= control target key start
LH: loop header
LB: loop body
LE: loop exit
PB: predicated region body
PF: predicated region fallthrough
CT: control target
= control target key end

     0   :  { %8 = vsyncpa [#allocation3], 0  ;;  %s251_s0 = inlined_call_operand.hbm [shape: f32[8,64], index: 0, kind: input, shape index: {}]   ;;  %s252_s1 = inlined_call_operand.hbm [shape: f32[8,64], index: 1, kind: input, shape index: {}]   ;;  %s253_s2 = inlined_call_operand.vmem [shape: f32[3,64], index: 2, kind: input, shape index: {}]   ;;  %s254_s3 = inlined_call_operand.hbm [shape: f32[8,64], index: 3, kind: output, shape index: {}]  }
   0x1   :  { %9 = vsyncpa [#allocation6], 0 }
   0x2   :  { %10 = vsyncpa [#allocation4], 0  ;;  %s189_s12 = smov [#allocation2]   ;;  %s190_s14 = smov [#allocation5]  }
   0x3   :  { %s17_s13 = sshll.u32 %s189_s12, 4  ;;  %s32_s15 = sshll.u32 %s190_s14, 4  ;;  %s18_s13 = int_to_ptr.vmem [resolvable:$true] %s17_s13  ;;  %s33_s15 = int_to_ptr.vmem [resolvable:$true] %s32_s15 }
   0x4   :  { %s117_s18 = scalar_lea.hbm %s251_s0, 128 }
   0x5   :  { %p118_p0 = scmp.ne.s32.totalorder %s251_s0, %s117_s18  ;;  %p121_p1 = scmp.lt.u32.totalorder %s117_s18, %s251_s0 }
   0x7   :  { %p123_p2 = pnand %p121_p1, %p118_p0 }
   0x9   :  { %126 = shalt.err (!%p123_p2)
}
   0xa   :  { %s127_s23 = scalar_lea.vmem %s18_s13, 128  ;;  %p132_p4 = scmp.lt.s32.totalorder %s18_s13, %s18_s13 }
   0xb   :  { %p128_p3 = scmp.ne.s32.totalorder %s18_s13, %s127_s23  ;;  %p133_p5 = scmp.lt.s32.totalorder %s127_s23, %s127_s23 }
   0xd   :  { %p134_p6 = por %p133_p5, %p132_p4 }
   0xf   :  { %p135_p7 = pnand %p134_p6, %p128_p3 }
  0x11   :  { %138 = shalt.err (!%p135_p7)
}
  0x12   :  { %20 = dma.hbm_to_vmem [thread:$0]  %s251_s0, 128, %s18_s13, [#allocation3]  }
  0x13   :  { %s139_s28 = scalar_lea.hbm %s252_s1, 128 }
  0x14   :  { %p140_p8 = scmp.ne.s32.totalorder %s252_s1, %s139_s28  ;;  %p143_p9 = scmp.lt.u32.totalorder %s139_s28, %s252_s1 }
  0x16   :  { %p145_p10 = pnand %p143_p9, %p140_p8 }
  0x18   :  { %148 = shalt.err (!%p145_p10)
}
  0x19   :  { %s149_s6 = scalar_lea.vmem %s33_s15, 128  ;;  %p154_p12 = scmp.lt.s32.totalorder %s33_s15, %s33_s15 }
  0x1a   :  { %p150_p11 = scmp.ne.s32.totalorder %s33_s15, %s149_s6  ;;  %p155_p13 = scmp.lt.s32.totalorder %s149_s6, %s149_s6 }
  0x1c   :  { %p156_p0 = por %p155_p13, %p154_p12 }
  0x1e   :  { %p157_p1 = pnand %p156_p0, %p150_p11 }
  0x20   :  { %160 = shalt.err (!%p157_p1)
}
  0x21   :  { %35 = dma.hbm_to_vmem [thread:$0]  %s252_s1, 128, %s33_s15, [#allocation6]  }
  0x22   :  { %183 = dma.done.wait [#allocation3], 128  }
  0x23   :  { %184 = vsyncadd [#allocation3], 4294967168 }
  0x24   :  { %185 = dma.done.wait [#allocation6], 128  }
  0x25   :  { %186 = vsyncadd [#allocation6], 4294967168  ;;  %v61_v0 = vlaneseq  ;;  %v48_v5 = vld [vmem:[#allocation2] sm:$0xff]  ;;  %vm74_vm0 = vcmask 1046528   ;;  %vm88_vm1 = vcmask 1045504   ;;  %s191_s1 = smov [#allocation7]  }
  0x26   :  { %v60_v6 = vld [vmem:[%s253_s2] sm:$0x7]  ;;  %s102_s10 = sshll.u32 %s191_s1, 4  ;;  %vm94_vm2 = vcmask 523264   ;;  %s103_s10 = int_to_ptr.vmem [resolvable:$true] %s102_s10 }
  0x27   :  { %v62_v1 = vshrl.u32 %v61_v0, 7  ;;  %s161_s2 = scalar_lea.vmem %s103_s10, 128  ;;  %p166_p3 = scmp.lt.s32.totalorder %s103_s10, %s103_s10 }
  0x28   :  { %p162_p2 = scmp.ne.s32.totalorder %s103_s10, %s161_s2  ;;  %p167_p4 = scmp.lt.s32.totalorder %s161_s2, %s161_s2 }
  0x29   :  { %v63_v2 = vsub.s32 0, %v62_v1  ;;  %v68_v3 = vsub.s32 1, %v62_v1  ;;  %v82_v4 = vsub.s32 2, %v62_v1 }
  0x2a   :  { %p168_p5 = por %p167_p4, %p166_p3 }
  0x2b   :  { %v64_v7 = vrot.slane %v60_v6, %v63_v2  ;;  %v69_v8 = vrot.slane %v60_v6, %v68_v3  ;;  %v83_v9 = vrot.slane %v60_v6, %v82_v4 }
  0x2c   :  { %p169_p6 = pnand %p168_p5, %p162_p2 }
  0x2d   :  { %v70_v10 = vmul.f32 %v69_v8, %v48_v5  ;;  %v71_v11 = vmul.f32 0.0, %v69_v8  ;;  %v84_v12 = vmul.f32 %v83_v9, %v48_v5  ;;  %v65_v13 = vmul.f32 %v64_v7, %v48_v5 }
  0x2e   :  { %v85_v14 = vmul.f32 0.0, %v83_v9 }
  0x2f   :  { %v75_v15 = vrot.slane %v70_v10, 1  ;;  %v76_v16 = vrot.slane %v71_v11, 1  ;;  %v89_v17 = vrot.slane %v84_v12, 2 }
  0x30   :  { %v90_v18 = vrot.slane %v85_v14, 2 }
  0x31   :  { %v77_v19 = vsel %vm74_vm0, %v75_v15, %v76_v16 }
  0x32   :  { %v79_v20 = vadd.f32 %v77_v19, %v65_v13  ;;  %v91_v21 = vsel %vm88_vm1, %v89_v17, %v90_v18 }
  0x34   :  { %v93_v22 = vadd.f32 %v91_v21, %v79_v20 }
  0x36   :  { %95 = vst.msk [vmem:[#allocation7] sm:$0xff] %vm94_vm2, %v93_v22 }
  0x37   :  { %172 = shalt.err (!%p169_p6)
}
  0x38   :  { %s173_s13 = scalar_lea.hbm %s254_s3, 128 }
  0x39   :  { %p174_p7 = scmp.ne.s32.totalorder %s254_s3, %s173_s13  ;;  %p177_p8 = scmp.lt.u32.totalorder %s173_s13, %s254_s3 }
  0x3b   :  { %p179_p9 = pnand %p177_p8, %p174_p7 }
  0x3d   :  { %182 = shalt.err (!%p179_p9)
}
  0x3e   :  { %105 = dma.vmem_to_hbm [thread:$0]  %s103_s10, 128, %s254_s3, [#allocation4]  }
  0x3f   :  { %187 = dma.done.wait [#allocation4], 128  }
  0x40   :  { %188 = vsyncadd [#allocation4], 4294967168 }
  0x41   :  { %109 = vsyncpa [#allocation3], 1 }
  0x42   :  { %110 = vsyncpa [#allocation6], 1 }
  0x43   :  { %111 = vsyncpa [#allocation4], 1 }

</bundles_post_ra>
